<compile_context>
chip_gen: v7x
topology: tpu7x:2x2x1
jax: 0.10.0
libtpu: 0.0.40
codegen_flags: <defaults>
</compile_context>

<pallas_src>
import math
from functools import lru_cache

import jax
import jax.numpy as jnp
import numpy as np
from jax.experimental import pallas as pl
from jax.experimental.pallas import tpu as pltpu


def _round_up(x, m):
    return ((x + m - 1) // m) * m


# ----------------------------------------------------------------------------
# Filter construction (host-side NumPy, cached; mirrors init_kernel)
# ----------------------------------------------------------------------------
@lru_cache(maxsize=None)
def _make_filters(frame_len, frame_hop, num_fft):
    fft_size = 2 ** math.ceil(math.log2(frame_len)) if not num_fft else num_fft
    nbin = fft_size // 2 + 1
    nbin_p = _round_up(nbin, 8)                       # sublane-aligned half
    n = np.arange(frame_len, dtype=np.float64)
    # torch.hann_window(L) is periodic: 0.5 - 0.5*cos(2*pi*n/L); module uses sqrt.
    window = np.sqrt(0.5 - 0.5 * np.cos(2.0 * np.pi * n / frame_len))
    S_ = 0.5 * (fft_size * fft_size / frame_hop) ** 0.5
    w = np.fft.rfft(np.eye(fft_size) / S_, axis=-1)   # (fft_size, nbin) complex
    real_t = np.real(w).T * window[None, :]           # (nbin, L)
    imag_t = np.imag(w).T * window[None, :]           # (nbin, L)
    # Fused filter: [real ; zero pad ; imag ; zero pad]  ->  (2*nbin_p, L)
    kf = np.zeros((2 * nbin_p, frame_len), dtype=np.float32)
    kf[:nbin] = real_t
    kf[nbin_p:nbin_p + nbin] = imag_t
    return jnp.asarray(kf), fft_size, nbin, nbin_p


# ----------------------------------------------------------------------------
# Pallas kernel: per (batch, time-tile) block compute real/imag/mag/phase
# ----------------------------------------------------------------------------
def _make_stft_kernel(nbin, nbin_p):
    def _stft_kernel(xT_ref, kf_ref, m_ref, p_ref, r_ref, i_ref):
        xt = xT_ref[0]                                          # (L, TILE_T)
        # One fused MXU pass: (2*nbin_p, L) @ (L, TILE_T)
        c = jnp.dot(kf_ref[...], xt, preferred_element_type=jnp.float32)
        r = c[:nbin]                                            # (nbin, TILE_T)
        i = c[nbin_p:nbin_p + nbin]                             # aligned start
        r_ref[0] = r
        i_ref[0] = i
        m_ref[0] = jnp.sqrt(r * r + i * i)
        p_ref[0] = jnp.arctan2(i, r)
    return _stft_kernel


def _stft_pallas_call(framesT, kf, nbin, nbin_p, tile_t, vmem_limit):
    N, L, t_out = framesT.shape
    grid = (N, pl.cdiv(t_out, tile_t))                 # partial last tile OK

    frame_spec = pl.BlockSpec((1, L, tile_t), lambda n, t: (n, 0, t))
    # Fused filter: constant block index -> never re-DMA'd across the grid.
    # (Pallas still allocates two buffers for it; that cost is included in the
    # VMEM budget used to size tile_t.)
    k_spec = pl.BlockSpec((2 * nbin_p, L), lambda n, t: (0, 0))
    out_spec = pl.BlockSpec((1, nbin, tile_t), lambda n, t: (n, 0, t))

    out_shape = tuple(
        jax.ShapeDtypeStruct((N, nbin, t_out), jnp.float32) for _ in range(4)
    )
    return pl.pallas_call(
        _make_stft_kernel(nbin, nbin_p),
        out_shape=out_shape,
        grid=grid,
        in_specs=[frame_spec, k_spec],
        out_specs=tuple(out_spec for _ in range(4)),
        compiler_params=pltpu.CompilerParams(
            dimension_semantics=("parallel", "parallel"),
            vmem_limit_bytes=vmem_limit,
        ),
    )(framesT, kf)


# ----------------------------------------------------------------------------
# Wrapper (frame extraction stays in XLA for now; outputs in torch layout)
# ----------------------------------------------------------------------------
def stft_forward(x, frame_len, frame_hop, num_fft=None, tile_t=None):
    if x.ndim == 3:          # (N, 1, T)  — mirror torch's unsqueeze path
        assert x.shape[1] == 1
        x = x[:, 0, :]
    assert x.ndim == 2, "Expect 2D/3D tensor"

    kf, fft_size, nbin, nbin_p = _make_filters(frame_len, frame_hop, num_fft)

    N, T = x.shape
    t_out = (T - frame_len) // frame_hop + 1

    # Per-step VMEM estimate: double-buffered input/output blocks plus the
    # (double-buffered) resident fused filter.
    def _vmem_bytes(tt):
        blk_in = frame_len * tt * 4
        blk_out = 4 * nbin * tt * 4
        filt = 2 * nbin_p * frame_len * 4
        return 2 * (blk_in + blk_out) + 2 * filt

    if tile_t is None:
        # <= 512: keeps several time tiles per batch element (software
        # pipelining + megacore sharding) and already sits near the HBM
        # roofline; shrink further if the working set would blow the VMEM
        # budget (v7x has only 64 MiB physical VMEM per TC).
        tile_t = max(128, min(512, _round_up(t_out, 128)))
        while tile_t > 128 and _vmem_bytes(tile_t) > 24 * 1024 * 1024:
            tile_t -= 128
    vmem_limit = int(min(64 * 1024 * 1024,
                         max(32 * 1024 * 1024, _vmem_bytes(tile_t) + (4 << 20))))

    # Frame extraction: framesT[n, l, t] = x[n, t*hop + l].
    # TODO(synk): this gather still materializes an overlapped (L/hop x) copy
    # of x in HBM; fusing it into the kernel needs overlapping-window streaming
    # of hop-reshaped x plus hop-wide sub-matmuls (see header note).
    idx = jnp.arange(frame_len)[:, None] + (jnp.arange(t_out) * frame_hop)[None, :]
    framesT = x[:, idx].astype(jnp.float32)            # (N, L, t_out)

    # No padding / trimming: Pallas masks the partial last time tile.
    m, p, r, i = _stft_pallas_call(framesT, kf, nbin, nbin_p, tile_t, vmem_limit)
    return m, p, r, i


# ----------------------------------------------------------------------------
# Reference (plain JAX, same math) for a correctness check
# ----------------------------------------------------------------------------
def stft_reference(x, frame_len, frame_hop, num_fft=None):
    if x.ndim == 3:
        x = x[:, 0, :]
    kf, fft_size, nbin, nbin_p = _make_filters(frame_len, frame_hop, num_fft)
    kr = kf[:nbin]
    ki = kf[nbin_p:nbin_p + nbin]
    N, T = x.shape
    t_out = (T - frame_len) // frame_hop + 1
    starts = jnp.arange(t_out) * frame_hop
    idx = starts[:, None] + jnp.arange(frame_len)[None, :]
    frames = x[:, idx]                                  # (N, T_out, L)
    r = jnp.einsum("ntl,fl->nft", frames, kr)
    i = jnp.einsum("ntl,fl->nft", frames, ki)
    m = jnp.sqrt(r * r + i * i)
    p = jnp.arctan2(i, r)
    return m, p, r, i


if __name__ == "__main__":
    key = jax.random.PRNGKey(0)

    # Case 1: tiny shape, t_out = 15 (single partial time tile).
    frame_len, frame_hop = 16, 8
    N, T = 2, 128
    x1 = jax.random.normal(key, (N, T), dtype=jnp.float32)
    outs1 = jax.block_until_ready(stft_forward(x1, frame_len, frame_hop))
    refs1 = stft_reference(x1, frame_len, frame_hop)
    t_out1 = (T - frame_len) // frame_hop + 1
    for o, rref in zip(outs1, refs1):
        assert o.shape == (N, frame_len // 2 + 1, t_out1)
        np.testing.assert_allclose(np.asarray(o), np.asarray(rref),
                                   rtol=1e-4, atol=1e-4)

    # Case 2: multiple time tiles with a non-multiple-of-128 t_out
    # (exercises Pallas masking of the partial boundary block).
    T2 = 8 * 129 + 16            # -> t_out = 130
    x2 = jax.random.normal(jax.random.PRNGKey(1), (N, T2), dtype=jnp.float32)
    outs2 = jax.block_until_ready(
        stft_forward(x2, frame_len, frame_hop, tile_t=128))
    refs2 = stft_reference(x2, frame_len, frame_hop)
    t_out2 = (T2 - frame_len) // frame_hop + 1
    for o, rref in zip(outs2, refs2):
        assert o.shape == (N, frame_len // 2 + 1, t_out2)
        np.testing.assert_allclose(np.asarray(o), np.asarray(rref),
                                   rtol=1e-4, atol=1e-4)

    print("KERNEL_OK")
</pallas_src>

<mosaic_0001>
module attributes {stable_mosaic.version = 11 : i64} {
  func.func @_stft_kernel(%arg0: i32, %arg1: i32, %arg2: memref<1x16x128xf32, #tpu.memory_space<vmem>>, %arg3: memref<32x16xf32, #tpu.memory_space<vmem>>, %arg4: memref<1x9x128xf32, #tpu.memory_space<vmem>>, %arg5: memref<1x9x128xf32, #tpu.memory_space<vmem>>, %arg6: memref<1x9x128xf32, #tpu.memory_space<vmem>>, %arg7: memref<1x9x128xf32, #tpu.memory_space<vmem>>) attributes {dimension_semantics = [#tpu.dimension_semantics<parallel>, #tpu.dimension_semantics<parallel>], iteration_bounds = array<i64: 2, 1>, scalar_prefetch = 0 : i64, scratch_operands = 0 : i64, tpu.core_type = #tpu.core_type<tc>, window_params = [{transform_indices = @transform_0, window_bounds = array<i64: 1, 16, 128>}, {pipeline_mode = #tpu.pipeline_mode<synchronous>, transform_indices = @transform_1, window_bounds = array<i64: 32, 16>}, {transform_indices = @transform_2, window_bounds = array<i64: 1, 9, 128>}, {transform_indices = @transform_3, window_bounds = array<i64: 1, 9, 128>}, {transform_indices = @transform_4, window_bounds = array<i64: 1, 9, 128>}, {transform_indices = @transform_5, window_bounds = array<i64: 1, 9, 128>}]} {
    %c0 = arith.constant 0 : index
    %c0_0 = arith.constant 0 : index
    %c0_1 = arith.constant 0 : index
    %0 = vector.load %arg2[%c0, %c0_0, %c0_1] : memref<1x16x128xf32, #tpu.memory_space<vmem>>, vector<1x16x128xf32>
    %1 = vector.shape_cast %0 : vector<1x16x128xf32> to vector<16x128xf32>
    %c0_2 = arith.constant 0 : index
    %c0_3 = arith.constant 0 : index
    %2 = vector.load %arg3[%c0_2, %c0_3] : memref<32x16xf32, #tpu.memory_space<vmem>>, vector<32x16xf32>
    %cst = arith.constant dense<0.000000e+00> : vector<32x128xf32>
    %3 = tpu.matmul %2, %1, %cst {dimension_numbers = #tpu.dot_dimension_numbers<[1], [0], [0], [1], [0, 0, 1, 1], [], []>} : vector<32x16xf32>, vector<16x128xf32>, vector<32x128xf32> -> vector<32x128xf32>
    %4 = vector.extract_strided_slice %3 {offsets = [0, 0], sizes = [9, 128], strides = [1, 1]} : vector<32x128xf32> to vector<9x128xf32>
    %5 = vector.extract_strided_slice %3 {offsets = [16, 0], sizes = [9, 128], strides = [1, 1]} : vector<32x128xf32> to vector<9x128xf32>
    %c0_4 = arith.constant 0 : index
    %c0_5 = arith.constant 0 : index
    %c0_6 = arith.constant 0 : index
    %6 = vector.load %arg6[%c0_4, %c0_5, %c0_6] : memref<1x9x128xf32, #tpu.memory_space<vmem>>, vector<1x9x128xf32>
    %7 = vector.shape_cast %6 : vector<1x9x128xf32> to vector<9x128xf32>
    %8 = vector.shape_cast %4 : vector<9x128xf32> to vector<1x9x128xf32>
    tpu.vector_store %arg6[%c0_4, %c0_5, %c0_6], %8 {strides = array<i32>} : memref<1x9x128xf32, #tpu.memory_space<vmem>>, vector<1x9x128xf32>,
    %c0_7 = arith.constant 0 : index
    %c0_8 = arith.constant 0 : index
    %c0_9 = arith.constant 0 : index
    %9 = vector.load %arg7[%c0_7, %c0_8, %c0_9] : memref<1x9x128xf32, #tpu.memory_space<vmem>>, vector<1x9x128xf32>
    %10 = vector.shape_cast %9 : vector<1x9x128xf32> to vector<9x128xf32>
    %11 = vector.shape_cast %5 : vector<9x128xf32> to vector<1x9x128xf32>
    tpu.vector_store %arg7[%c0_7, %c0_8, %c0_9], %11 {strides = array<i32>} : memref<1x9x128xf32, #tpu.memory_space<vmem>>, vector<1x9x128xf32>,
    %12 = arith.mulf %4, %4 : vector<9x128xf32>
    %13 = arith.mulf %5, %5 : vector<9x128xf32>
    %14 = arith.addf %12, %13 : vector<9x128xf32>
    %15 = math.sqrt %14 : vector<9x128xf32>
    %c0_10 = arith.constant 0 : index
    %c0_11 = arith.constant 0 : index
    %c0_12 = arith.constant 0 : index
    %16 = vector.load %arg4[%c0_10, %c0_11, %c0_12] : memref<1x9x128xf32, #tpu.memory_space<vmem>>, vector<1x9x128xf32>
    %17 = vector.shape_cast %16 : vector<1x9x128xf32> to vector<9x128xf32>
    %18 = vector.shape_cast %15 : vector<9x128xf32> to vector<1x9x128xf32>
    tpu.vector_store %arg4[%c0_10, %c0_11, %c0_12], %18 {strides = array<i32>} : memref<1x9x128xf32, #tpu.memory_space<vmem>>, vector<1x9x128xf32>,
    %19 = math.atan2 %5, %4 : vector<9x128xf32>
    %c0_13 = arith.constant 0 : index
    %c0_14 = arith.constant 0 : index
    %c0_15 = arith.constant 0 : index
    %20 = vector.load %arg5[%c0_13, %c0_14, %c0_15] : memref<1x9x128xf32, #tpu.memory_space<vmem>>, vector<1x9x128xf32>
    %21 = vector.shape_cast %20 : vector<1x9x128xf32> to vector<9x128xf32>
    %22 = vector.shape_cast %19 : vector<9x128xf32> to vector<1x9x128xf32>
    tpu.vector_store %arg5[%c0_13, %c0_14, %c0_15], %22 {strides = array<i32>} : memref<1x9x128xf32, #tpu.memory_space<vmem>>, vector<1x9x128xf32>,
    return
  }
  func.func @transform_0(%arg0: i32, %arg1: i32) -> (i32, i32, i32) {
    %c0_i32 = arith.constant 0 : i32
    %c0_i32_0 = arith.constant 0 : i32
    return %arg0, %c0_i32, %arg1 : i32, i32, i32
  }
  func.func @transform_1(%arg0: i32, %arg1: i32) -> (i32, i32) {
    %c0_i32 = arith.constant 0 : i32
    %c0_i32_0 = arith.constant 0 : i32
    %c0_i32_1 = arith.constant 0 : i32
    return %c0_i32, %c0_i32_0 : i32, i32
  }
  func.func @transform_2(%arg0: i32, %arg1: i32) -> (i32, i32, i32) {
    %c0_i32 = arith.constant 0 : i32
    %c0_i32_0 = arith.constant 0 : i32
    return %arg0, %c0_i32, %arg1 : i32, i32, i32
  }
  func.func @transform_3(%arg0: i32, %arg1: i32) -> (i32, i32, i32) {
    %c0_i32 = arith.constant 0 : i32
    %c0_i32_0 = arith.constant 0 : i32
    return %arg0, %c0_i32, %arg1 : i32, i32, i32
  }
  func.func @transform_4(%arg0: i32, %arg1: i32) -> (i32, i32, i32) {
    %c0_i32 = arith.constant 0 : i32
    %c0_i32_0 = arith.constant 0 : i32
    return %arg0, %c0_i32, %arg1 : i32, i32, i32
  }
  func.func @transform_5(%arg0: i32, %arg1: i32) -> (i32, i32, i32) {
    %c0_i32 = arith.constant 0 : i32
    %c0_i32_0 = arith.constant 0 : i32
    return %arg0, %c0_i32, %arg1 : i32, i32, i32
  }
}

</mosaic_0001>

<bundles_post_ra>
// kernel: tpu_custom_call.1
= control target key start
LH: loop header
LB: loop body
LE: loop exit
PB: predicated region body
PF: predicated region fallthrough
CT: control target
= control target key end

     0   :  { %s905_s18 = smov 0   ;;  %s907_s19 = smov 0   ;;  %s1064_s0 = inlined_call_operand.vmem [shape: f32[2,16,15], index: 0, kind: input, shape index: {}]   ;;  %s1065_s1 = inlined_call_operand.vmem [shape: f32[32,16], index: 1, kind: input, shape index: {}]   ;;  %s1066_s2 = inlined_call_operand.vmem [shape: f32[2,9,15], index: 2, kind: output, shape index: {0}]   ;;  %s1067_s3 = inlined_call_operand.vmem [shape: f32[2,9,15], index: 3, kind: output, shape index: {1}]   ;;  %s1068_s4 = inlined_call_operand.vmem [shape: f32[2,9,15], index: 4, kind: output, shape index: {2}]   ;;  %s1069_s5 = inlined_call_operand.vmem [shape: f32[2,9,15], index: 5, kind: output, shape index: {3}]  }
   0x1   :  { %s909_s20 = smov 0  }
   0x2 LB: > { %s28_s21 = sadd.s32 1, %s867_s19  ;;  %p771_p0 = scmp.ge.s32.totalorder %s871_s20, 1  ;;  %s871_s20 = sphi %s909_s20, %s16_s20   ;;  %s867_s19 = sphi %s907_s19, %s1079_s19   ;;  %s863_s18 = sphi %s905_s18, %s1078_s18  }
   0x3   : > { %p30_p1 = scmp.ge.s32.totalorder %s28_s21, 2  ;;  %p219_p2 = scmp.lt.s32.totalorder %s871_s20, 3 }
   0x5   : > { %s1081_s21 = smov (%p30_p1, %s28_s21), 0  ;;  %p220_p3 = pnand %p771_p0, %p219_p2 }
   0x6   : > { %p277_p4 = scmp.lt.s32.totalorder (!%p220_p3), %s863_s18, 1  ;;  %v319_v0 = vld [vmem:[%s1065_s1] sm:$0xff] (!%p220_p3)  ;;  %vm323_vm0 = vcmask (!%p220_p3), 130048   ;;  %v321_v1 = vld [vmem:[%s1065_s1 + $0x10] sm:$0xff] (!%p220_p3)  ;;  %v320_v5 = vld [vmem:[%s1065_s1 + $0x8] sm:$0xff] (!%p220_p3) }
   0x7   : > { %223 = sbr.rel (%p220_p3) target bundleno = 307 (0x133), region = 28  ;;  %803 = vmatprep.mubr.msk.f32.mxu0 (!%p220_p3), %vm323_vm0, %v319_v0  ;;  %806 = vmatprep.mubr.msk.f32.mxu1 (!%p220_p3), %vm323_vm0, %v321_v1  ;;  %v322_v6 = vld [vmem:[%s1065_s1 + $0x18] sm:$0xff] (!%p220_p3) }
   0xe   : > { %s1083_s18 = smov (!%p277_p4, %s863_s18), 1 }
   0xf   : > { %s931_s26 = sshll.u32 %s1083_s18, 4 }
  0x10   : > { %s284_s29 = scalar_lea.vmem %s1064_s0, %s931_s26  ;;  %s308_s11 = scalar_lea.vmem %s1068_s4, %s931_s26 }
  0x11   : > { %v317_v2 = vld [vmem:[%s284_s29] sm:$0xff]  ;;  %v318_v3 = vld [vmem:[%s284_s29 + $0x8] sm:$0xff]  ;;  %s316_s14 = scalar_lea.vmem %s1069_s5, %s931_s26  ;;  %s292_s17 = scalar_lea.vmem %s1066_s2, %s931_s26 }
  0x12   : > { %v809_v4 = vpack.c.bf16 %v318_v3, %v317_v2  ;;  %s300_s23 = scalar_lea.vmem %s1067_s3, %s931_s26 }
  0x14   : > { %810 = vmatprep.subr.bf16.mxu0 %v809_v4  ;;  %813 = vmatprep.subr.bf16.mxu1 %v809_v4 }
  0x15   : > { %812 = vmatpush3.bf16.msra.mxu0 %v809_v4  ;;  %814 = vmatpush3.bf16.msra.mxu1 %v809_v4 }
  0x18   : > { %804 = vmatmul.mubr.msk.f32.vlgmr.msra.gmra.mrb[0].mxu0 %vm323_vm0, %v320_v5  ;;  %807 = vmatmul.mubr.msk.f32.vlgmr.msra.gmra.mrb[0].mxu1 %vm323_vm0, %v322_v6 }
  0xeb   : > { %v953_v7 = vpop.f32.mrb[0].mxu0  ;;  %v955_v8 = vpop.f32.mrb[0].mxu1 }
  0xec   : > { %v426_v9 = vmul.f32 %v953_v7, %v953_v7  ;;  %v960_v10 = vand.u32 2147483647, %v953_v7  ;;  %v962_v11 = vpop.f32.mrb[1].mxu0  ;;  %422 = vst [vmem:[%s308_s11 + $0x8] sm:$0x1] %v953_v7  ;;  %v965_v12 = vpop.f32.mrb[1].mxu1  ;;  %vm528_vm1 = vcmp.ne.f32.partialorder %v953_v7, %v953_v7  ;;  %v428_v13 = vmul.f32 %v955_v8, %v955_v8 }
  0xed   : > { %424 = vst [vmem:[%s316_s14 + $0x8] sm:$0x1] %v955_v8  ;;  %v973_v14 = vand.u32 2147483647, %v955_v8  ;;  %421 = vst [vmem:[%s308_s11] sm:$0xff] %v962_v11  ;;  %vm529_vm2 = vcmp.ne.f32.partialorder %v955_v8, %v955_v8  ;;  %v990_v19 = vand.u32 2147483647, %v962_v11  ;;  %v425_v20 = vmul.f32 %v962_v11, %v962_v11 }
  0xee   : > { %423 = vst [vmem:[%s316_s14] sm:$0xff] %v965_v12  ;;  %v430_v15 = vadd.f32 %v428_v13, %v426_v9  ;;  %vm985_vm4 = vmor %vm528_vm1, %vm529_vm2  ;;  %vm481_vm5 = vcmp.ne.f32.partialorder %v962_v11, %v962_v11  ;;  %vm534_vm6 = vcmp.eq.s32.totalorder %v960_v10, inf  ;;  %v427_v21 = vmul.f32 %v965_v12, %v965_v12 }
  0xef   : > { %v496_v16 = vmin.f32 %v960_v10, %v973_v14  ;;  %v497_v17 = vmax.f32 %v960_v10, %v973_v14  ;;  %vm518_vm3 = vcmp.gt.f32.partialorder %v973_v14, %v960_v10  ;;  %vm535_vm7 = vcmp.eq.s32.totalorder %v973_v14, inf }
  0xf0   : > { %841 = vrsqrt.f32 %v430_v15  ;;  %v1001_v22 = vand.u32 2147483647, %v965_v12  ;;  %vm1003_vm8 = vmand %vm534_vm6, %vm535_vm7  ;;  %vm482_vm9 = vcmp.ne.f32.partialorder %v965_v12, %v965_v12  ;;  %vm487_vm10 = vcmp.eq.s32.totalorder %v990_v19, inf }
  0xf1   : > { %843 = vrcp.f32 %v497_v17  ;;  %v429_v24 = vadd.f32 %v427_v21, %v425_v20  ;;  %vm1016_vm12 = vmor %vm481_vm5, %vm482_vm9  ;;  %vm440_vm15 = vcmp.eq.f32.partialorder %v430_v15, inf  ;;  %v443_v32 = vand.u32 2147483648, %v430_v15 }
  0xf2   : > { %v449_v25 = vmin.f32 %v990_v19, %v1001_v22  ;;  %v450_v26 = vmax.f32 %v990_v19, %v1001_v22  ;;  %vm471_vm11 = vcmp.gt.f32.partialorder %v1001_v22, %v990_v19  ;;  %vm488_vm13 = vcmp.eq.s32.totalorder %v1001_v22, inf }
  0xf3   : > { %845 = vrsqrt.f32 %v429_v24  ;;  %vm1021_vm14 = vmand %vm487_vm10, %vm488_vm13  ;;  %vm442_vm0 = vcmp.eq.f32.partialorder %v430_v15, 0.0  ;;  %vm433_vm1 = vcmp.eq.f32.partialorder %v429_v24, inf  ;;  %v436_v42 = vand.u32 2147483648, %v429_v24 }
  0xf4   : > { %847 = vrcp.f32 %v450_v26  ;;  %vm435_vm2 = vcmp.eq.f32.partialorder %v429_v24, 0.0  ;;  %vm524_vm5 = vcmp.lt.s32.totalorder %v953_v7, 0  ;;  %vm521_vm6 = vcmp.lt.f32.partialorder %v953_v7, 0.0 }
  0xf5   : > { %vm526_vm7 = vcmp.eq.f32.partialorder %v955_v8, 0.0  ;;  %v539_v14 = vand.u32 2147483648, %v955_v8  ;;  %vm474_vm9 = vcmp.lt.f32.partialorder %v962_v11, 0.0 }
  0xfa   : > { %v842_v29 = vpop.eup %841 }
  0xfb   : > { %v844_v30 = vpop.eup %843  ;;  %v439_v31 = vmul.f32 %v842_v29, %v430_v15 }
  0xfc   : > { %v499_v33 = vmul.f32 %v844_v30, %v496_v16 }
  0xfd   : > { %v441_v34 = vsel %vm440_vm15, %v430_v15, %v439_v31  ;;  %v846_v37 = vpop.eup %845  ;;  %v873_v31 = vmov 0.0  }
  0xfe   : > { %v444_v35 = vsel %vm442_vm0, %v443_v32, %v441_v34  ;;  %v500_v36 = vmul.f32 %v499_v33, %v499_v33  ;;  %v848_v39 = vpop.eup %847  ;;  %v432_v40 = vmul.f32 %v846_v37, %v429_v24  ;;  %v525_v32 = vsel %vm524_vm5, 3.1415927, %v873_v31 }
  0xff   : > { %446 = vst [vmem:[%s292_s17 + $0x8] sm:$0x1] %v444_v35  ;;  %v452_v43 = vmul.f32 %v848_v39, %v449_v25 }
 0x100   : > { %v501_v38 = vmul.f32 0.002785687, %v500_v36  ;;  %v434_v44 = vsel %vm433_vm1, %v429_v24, %v432_v40 }
 0x101   : > { %v437_v46 = vsel %vm435_vm2, %v436_v42, %v434_v44  ;;  %v453_v47 = vmul.f32 %v452_v43, %v452_v43 }
 0x102   : > { %v502_v41 = vadd.f32 -0.015866, %v501_v38  ;;  %445 = vst [vmem:[%s292_s17] sm:$0xff] %v437_v46 }
 0x103   : > { %v454_v49 = vmul.f32 0.002785687, %v453_v47 }
 0x104   : > { %v503_v45 = vmul.f32 %v502_v41, %v500_v36 }
 0x105   : > { %v455_v51 = vadd.f32 -0.015866, %v454_v49 }
 0x106   : > { %v504_v48 = vadd.f32 0.04247222, %v503_v45 }
 0x107   : > { %v456_v53 = vmul.f32 %v455_v51, %v453_v47 }
 0x108   : > { %v505_v50 = vmul.f32 %v504_v48, %v500_v36 }
 0x109   : > { %v457_v55 = vadd.f32 0.04247222, %v456_v53 }
 0x10a   : > { %v506_v52 = vadd.f32 -0.074975304, %v505_v50 }
 0x10b   : > { %v458_v57 = vmul.f32 %v457_v55, %v453_v47 }
 0x10c   : > { %v507_v54 = vmul.f32 %v506_v52, %v500_v36 }
 0x10d   : > { %v459_v59 = vadd.f32 -0.074975304, %v458_v57 }
 0x10e   : > { %v508_v56 = vadd.f32 0.1064488, %v507_v54 }
 0x10f   : > { %v460_v61 = vmul.f32 %v459_v59, %v453_v47 }
 0x110   : > { %v509_v58 = vmul.f32 %v508_v56, %v500_v36 }
 0x111   : > { %v461_v63 = vadd.f32 0.1064488, %v460_v61 }
 0x112   : > { %v510_v60 = vadd.f32 -0.14207031, %v509_v58 }
 0x113   : > { %v462_v1 = vmul.f32 %v461_v63, %v453_v47 }
 0x114   : > { %v511_v62 = vmul.f32 %v510_v60, %v500_v36 }
 0x115   : > { %v463_v3 = vadd.f32 -0.14207031, %v462_v1 }
 0x116   : > { %v512_v0 = vadd.f32 0.19993454, %v511_v62 }
 0x117   : > { %v464_v5 = vmul.f32 %v463_v3, %v453_v47 }
 0x118   : > { %v513_v2 = vmul.f32 %v512_v0, %v500_v36 }
 0x119   : > { %v465_v9 = vadd.f32 0.19993454, %v464_v5 }
 0x11a   : > { %v514_v4 = vadd.f32 -0.33333147, %v513_v2 }
 0x11b   : > { %v466_v15 = vmul.f32 %v465_v9, %v453_v47 }
 0x11c   : > { %v515_v6 = vmul.f32 %v514_v4, %v500_v36  ;;  %v874_v36 = vmov 0.7853982  }
 0x11d   : > { %v467_v17 = vadd.f32 -0.33333147, %v466_v15  ;;  %v533_v37 = vsel %vm521_vm6, 2.3561945, %v874_v36  ;;  %v486_v42 = vsel %vm474_vm9, 2.3561945, %v874_v36 }
 0x11e   : > { %v516_v13 = vmul.f32 %v515_v6, %v499_v33 }
 0x11f   : > { %v468_v21 = vmul.f32 %v467_v17, %v453_v47 }
 0x120   : > { %v517_v16 = vadd.f32 %v516_v13, %v499_v33 }
 0x121   : > { %v469_v25 = vmul.f32 %v468_v21, %v452_v43 }
 0x122   : > { %v519_v20 = vsub.f32 1.5707964, %v517_v16 }
 0x123   : > { %v470_v29 = vadd.f32 %v469_v25, %v452_v43 }
 0x124   : > { %v520_v24 = vsel %vm518_vm3, %v519_v20, %v517_v16  ;;  %vm477_vm3 = vcmp.lt.s32.totalorder %v962_v11, 0  ;;  %v492_v11 = vand.u32 2147483648, %v965_v12 }
 0x125   : > { %v522_v26 = vsub.f32 3.1415927, %v520_v24  ;;  %v472_v34 = vsub.f32 1.5707964, %v470_v29  ;;  %v478_v18 = vsel %vm477_vm3, 3.1415927, %v873_v31 }
 0x127   : > { %v523_v30 = vsel %vm521_vm6, %v522_v26, %v520_v24  ;;  %v473_v7 = vsel %vm471_vm11, %v472_v34, %v470_v29 }
 0x128   : > { %v527_v33 = vsel %vm526_vm7, %v525_v32, %v523_v30  ;;  %v475_v39 = vsub.f32 3.1415927, %v473_v7 }
 0x129   : > { %v531_v35 = vsel %vm985_vm4, nan, %v527_v33  ;;  %vm479_vm4 = vcmp.eq.f32.partialorder %v965_v12, 0.0 }
 0x12a   : > { %v537_v10 = vsel %vm1003_vm8, %v533_v37, %v531_v35  ;;  %v476_v41 = vsel %vm474_vm9, %v475_v39, %v473_v7 }
 0x12b   : > { %v538_v38 = vand.u32 2147483647, %v537_v10  ;;  %v480_v23 = vsel %vm479_vm4, %v478_v18, %v476_v41 }
 0x12c   : > { %v484_v19 = vsel %vm1016_vm12, nan, %v480_v23 }
 0x12d   : > { %v540_v40 = vor.u32 %v539_v14, %v538_v38  ;;  %v490_v8 = vsel %vm1021_vm14, %v486_v42, %v484_v19 }
 0x12e   : > { %v491_v22 = vand.u32 2147483647, %v490_v8 }
 0x12f   : > { %542 = vst [vmem:[%s300_s23 + $0x8] sm:$0x1] %v540_v40 }
 0x130   : > { %v493_v43 = vor.u32 %v492_v11, %v491_v22 }
 0x132   : > { %541 = vst [vmem:[%s300_s23] sm:$0xff] %v493_v43 }
 0x133 PF: > { %s16_s20 = sadd.s32 1, %s871_s20   ;;  %s1078_s18 = smov %s867_s19 }
 0x134   : > { %p13_p5 = scmp.ge.s32.totalorder %s16_s20, 4   ;;  %s1079_s19 = smov %s1081_s21 }
 0x136   :  { %15 = sbr.rel (!%p13_p5) target bundleno = 2 (0x2), region = 94 }

</bundles_post_ra>
